<compile_context>
chip_gen: v5e
topology: v5e:2x2
jax: 0.10.0
libtpu: 0.0.40
codegen_flags: <defaults>
</compile_context>

<pallas_src>
import functools
import math

import jax
import jax.numpy as jnp
from jax.experimental import pallas as pl
from jax.experimental.pallas import tpu as pltpu

S_SCALE = 30.0
MARGIN = 0.5
COS_M = math.cos(MARGIN)
SIN_M = math.sin(MARGIN)
TH = math.cos(math.pi - MARGIN)
MM = math.sin(math.pi - MARGIN) * MARGIN
BN_EPS = 1e-5
NORM_EPS = 1e-12  # F.normalize default eps


def _round_up(a, b):
    return (a + b - 1) // b * b


def _choose_tile(total, target):
    """Largest multiple-of-8 divisor of `total` that is <= target, else `total`."""
    if total <= target:
        return total
    start = target - (target % 8)
    for cand in range(start, 7, -8):
        if total % cand == 0:
            return cand
    return total  # fall back to the full (untiled) dimension


# ---------------------------------------------------------------------------
# Feature kernel: pool -> fc -> BN -> normalize, gridded over channel tiles.
# ---------------------------------------------------------------------------
def feature_kernel(x_ref, fc_wt_ref, fc_b_ref, bn_w_ref, bn_b_ref,
                   fnorm_ref, acc_ref, *, inv_hw):
    c = pl.program_id(0)

    @pl.when(c == 0)
    def _():
        acc_ref[...] = jnp.zeros_like(acc_ref)

    # AdaptiveAvgPool2d(1) over the spatial (lane) axis for this channel tile,
    # accumulated in f32.  Dropout(p=0.0) is identity.
    pooled = jnp.sum(x_ref[...].astype(jnp.float32), axis=2) * inv_hw   # (B, tC)

    # fc partial matmul for this channel tile: bf16 MXU inputs, f32 accumulate.
    acc_ref[...] += jnp.dot(pooled.astype(jnp.bfloat16), fc_wt_ref[...],
                            preferred_element_type=jnp.float32)

    @pl.when(c == pl.num_programs(0) - 1)
    def _():
        feat = acc_ref[...] + fc_b_ref[...]
        # BatchNorm1d, training-mode batch statistics (weight=1, bias=0 at init).
        mu = jnp.mean(feat, axis=0, keepdims=True)
        var = jnp.mean((feat - mu) ** 2, axis=0, keepdims=True)
        feat = (feat - mu) * jax.lax.rsqrt(var + BN_EPS) * bn_w_ref[...] + bn_b_ref[...]
        # F.normalize: x / max(||x||, eps) == x * rsqrt(max(||x||^2, eps^2))
        ssq = jnp.sum(feat * feat, axis=1, keepdims=True)
        fnorm_ref[...] = (feat * jax.lax.rsqrt(
            jnp.maximum(ssq, NORM_EPS * NORM_EPS))).astype(fnorm_ref.dtype)


# ---------------------------------------------------------------------------
# ArcMarginProduct kernel, gridded over class tiles (arc_w streamed as bf16).
# ---------------------------------------------------------------------------
def arcface_kernel(fnorm_ref, label_ref, inv_wn_ref, arc_w_ref, out_ref):
    j = pl.program_id(0)
    tn = out_ref.shape[1]

    # raw = f_norm @ W_tile^T without an in-kernel transpose (contract dim 1 vs 1),
    # bf16 MXU inputs with f32 accumulation.  W is *not* normalized element-wise;
    # the cosine columns are scaled by the per-class inverse norms instead.
    raw = jax.lax.dot_general(
        fnorm_ref[...], arc_w_ref[...],
        dimension_numbers=(((1,), (1,)), ((), ())),
        preferred_element_type=jnp.float32)                     # (B, TN)
    cosine = raw * inv_wn_ref[...]                              # (1, TN) broadcast

    # Clamp to avoid NaN when |cosine| slightly exceeds 1 from float error.
    sine = jnp.sqrt(jnp.clip(1.0 - cosine * cosine, 0.0, 1.0))
    phi = cosine * COS_M - sine * SIN_M
    phi = jnp.where(cosine > TH, phi, cosine - MM)              # easy_margin=False, ls_eps=0

    # Per-tile one_hot: compare global class index against the (B,1) labels.
    col = jax.lax.broadcasted_iota(jnp.int32, cosine.shape, 1) + j * tn
    one_hot = col == label_ref[...]

    out_ref[...] = jnp.where(one_hot, phi, cosine) * S_SCALE


# ---------------------------------------------------------------------------
# Wrapper
# ---------------------------------------------------------------------------
def imgnet_forward(x_nchw, label, fc_w, fc_b, bn_w, bn_b, arc_w, *,
                   block_classes=2048, block_channels=512, trim_padding=True):
    """ImgNet head forward. x_nchw is the backbone feature map (B, C, H, W)."""
    B, C, H, W = x_nchw.shape
    HW = H * W
    fc_dim = fc_w.shape[0]
    n_classes = arc_w.shape[0]

    # Layout-only plumbing (no HBM round trip of the feature map: reshape of
    # contiguous NCHW is free and x stays in its native dtype).
    x3 = x_nchw.reshape(B, C, HW)
    fc_wt = jnp.transpose(fc_w).astype(jnp.bfloat16)            # (C, fc_dim), tiny
    fc_b2 = fc_b.reshape(1, fc_dim).astype(jnp.float32)
    bn_w2 = bn_w.reshape(1, fc_dim).astype(jnp.float32)
    bn_b2 = bn_b.reshape(1, fc_dim).astype(jnp.float32)
    label2d = label.reshape(B, 1).astype(jnp.int32)

    # ---- feature kernel: grid over channel tiles -----------------------------
    tc = _choose_tile(C, block_channels)
    f_norm = pl.pallas_call(
        functools.partial(feature_kernel, inv_hw=1.0 / HW),
        out_shape=jax.ShapeDtypeStruct((B, fc_dim), jnp.bfloat16),
        grid_spec=pltpu.PrefetchScalarGridSpec(
            num_scalar_prefetch=0,
            grid=(C // tc,),
            in_specs=[
                pl.BlockSpec((B, tc, HW), lambda c: (0, c, 0)),   # x: streamed C tiles
                pl.BlockSpec((tc, fc_dim), lambda c: (c, 0)),     # fc weight tile (bf16)
                pl.BlockSpec((1, fc_dim), lambda c: (0, 0)),      # fc bias (resident)
                pl.BlockSpec((1, fc_dim), lambda c: (0, 0)),      # bn weight
                pl.BlockSpec((1, fc_dim), lambda c: (0, 0)),      # bn bias
            ],
            out_specs=pl.BlockSpec((B, fc_dim), lambda c: (0, 0)),
            scratch_shapes=[pltpu.VMEM((B, fc_dim), jnp.float32)],
        ),
        compiler_params=pltpu.CompilerParams(
            dimension_semantics=("arbitrary",)),                  # reduction over C
    )(x3, fc_wt, fc_b2, bn_w2, bn_b2)

    # ---- ArcFace classifier: grid over class tiles ----------------------------
    # Pad n_classes to a lane-dense multiple of the class tile (unmasked stores).
    n_pad = _round_up(n_classes, 128)
    tn = max(128, min(block_classes, n_pad) // 128 * 128)
    # v7x megacore: keep >= 2 tiles so the "parallel" axis splits across both TCs.
    if n_pad // tn < 2 and n_pad >= 256:
        tn = max(128, (n_pad // 2) // 128 * 128)
    n_pad = _round_up(n_pad, tn)

    # Per-class inverse norms in f32 (fuses with the one-time bf16 cast of arc_w
    # under jit; ideally the parameter itself lives in bf16).  Padded classes get
    # inv-norm 0 -> cosine 0 -> trimmed/ignored.
    inv_wn = jax.lax.rsqrt(
        jnp.maximum(jnp.sum(arc_w.astype(jnp.float32) ** 2, axis=1),
                    NORM_EPS * NORM_EPS))
    arc_w_bf = arc_w.astype(jnp.bfloat16)
    if n_pad != n_classes:
        arc_w_bf = jnp.pad(arc_w_bf, ((0, n_pad - n_classes), (0, 0)))
        inv_wn = jnp.pad(inv_wn, (0, n_pad - n_classes))
    inv_wn = inv_wn.reshape(1, n_pad)

    logits_padded = pl.pallas_call(
        arcface_kernel,
        out_shape=jax.ShapeDtypeStruct((B, n_pad), jnp.float32),
        grid_spec=pltpu.PrefetchScalarGridSpec(
            num_scalar_prefetch=0,
            grid=(n_pad // tn,),
            in_specs=[
                pl.BlockSpec((B, fc_dim), lambda j: (0, 0)),      # f_norm (bf16): resident
                pl.BlockSpec((B, 1), lambda j: (0, 0)),           # labels: tiny, resident
                pl.BlockSpec((1, tn), lambda j: (0, j)),          # per-class inv norms
                pl.BlockSpec((tn, fc_dim), lambda j: (j, 0)),     # arc_w: streamed bf16 tiles
            ],
            out_specs=pl.BlockSpec((B, tn), lambda j: (0, j)),
        ),
        compiler_params=pltpu.CompilerParams(
            dimension_semantics=("parallel",)),                   # megacore sharding
    )(f_norm, label2d, inv_wn, arc_w_bf)

    if trim_padding and n_pad != n_classes:
        # Optional: consumers that can mask the pad columns should pass
        # trim_padding=False to skip this extra HBM round trip.
        return logits_padded[:, :n_classes]
    return logits_padded


# ---------------------------------------------------------------------------
# Pure-JAX reference (mirrors the kernel's bf16 MXU paths; true PyTorch f32
# differs at the ~1e-3 cosine level).
# ---------------------------------------------------------------------------
def _reference(x_nchw, label, fc_w, fc_b, bn_w, bn_b, arc_w):
    B = x_nchw.shape[0]
    pooled = jnp.mean(x_nchw.astype(jnp.float32).reshape(B, x_nchw.shape[1], -1),
                      axis=-1)
    feat = jnp.dot(pooled.astype(jnp.bfloat16), fc_w.T.astype(jnp.bfloat16),
                   preferred_element_type=jnp.float32) + fc_b.reshape(1, -1)
    mu = feat.mean(axis=0, keepdims=True)
    var = ((feat - mu) ** 2).mean(axis=0, keepdims=True)
    feat = (feat - mu) * jax.lax.rsqrt(var + BN_EPS) * bn_w.reshape(1, -1) \
        + bn_b.reshape(1, -1)
    f_n = feat / jnp.maximum(jnp.linalg.norm(feat, axis=1, keepdims=True), NORM_EPS)
    w_n = arc_w / jnp.maximum(jnp.linalg.norm(arc_w, axis=1, keepdims=True), NORM_EPS)
    cosine = jnp.dot(f_n.astype(jnp.bfloat16), w_n.astype(jnp.bfloat16).T,
                     preferred_element_type=jnp.float32)
    sine = jnp.sqrt(jnp.clip(1.0 - cosine * cosine, 0.0, 1.0))
    phi = cosine * COS_M - sine * SIN_M
    phi = jnp.where(cosine > TH, phi, cosine - MM)
    one_hot = jax.nn.one_hot(label, arc_w.shape[0], dtype=jnp.float32)
    return (one_hot * phi + (1.0 - one_hot) * cosine) * S_SCALE


if __name__ == "__main__":
    # Small synthetic shapes consistent with the module's forward:
    # backbone feature map (B, C_feat, H, W), fc_dim, n_classes.
    B, C_FEAT, H, W = 4, 64, 8, 8
    FC_DIM, N_CLASSES = 128, 200

    key = jax.random.PRNGKey(0)
    kx, klab, kfc, karc = jax.random.split(key, 4)

    # Backbone feature map in its native (mixed-precision) bf16 dtype.
    x = jax.random.normal(kx, (B, C_FEAT, H, W), dtype=jnp.bfloat16)
    label = jax.random.randint(klab, (B,), 0, N_CLASSES, dtype=jnp.int32)

    # Deterministic parameter init (xavier-style scaling, synthetic weights).
    fc_std = math.sqrt(2.0 / (C_FEAT + FC_DIM))
    fc_w = jax.random.normal(kfc, (FC_DIM, C_FEAT), dtype=jnp.float32) * fc_std
    fc_b = jnp.zeros((FC_DIM,), dtype=jnp.float32)
    bn_w = jnp.ones((FC_DIM,), dtype=jnp.float32)
    bn_b = jnp.zeros((FC_DIM,), dtype=jnp.float32)
    arc_bound = math.sqrt(6.0 / (FC_DIM + N_CLASSES))
    arc_w = jax.random.uniform(karc, (N_CLASSES, FC_DIM), dtype=jnp.float32,
                               minval=-arc_bound, maxval=arc_bound)

    # block_channels=32 exercises the channel-tiled (accumulating) feature grid;
    # n_classes=200 pads to 256 and auto-splits into two 128-class tiles.
    fwd = jax.jit(functools.partial(imgnet_forward, block_channels=32))
    logits = fwd(x, label, fc_w, fc_b, bn_w, bn_b, arc_w)
    jax.block_until_ready(logits)

    assert logits.shape == (B, N_CLASSES)
    assert bool(jnp.all(jnp.isfinite(logits)))

    ref = _reference(x, label, fc_w, fc_b, bn_w, bn_b, arc_w)
    assert bool(jnp.allclose(logits, ref, rtol=5e-2, atol=5e-2)), (
        float(jnp.max(jnp.abs(logits - ref))))

    print("KERNEL_OK")
</pallas_src>

<mosaic_0001>
module attributes {stable_mosaic.version = 11 : i64} {
  func.func @feature_kernel(%arg0: i32, %arg1: memref<4x32x64xbf16, #tpu.memory_space<vmem>>, %arg2: memref<32x128xbf16, #tpu.memory_space<vmem>>, %arg3: memref<1x128xf32, #tpu.memory_space<vmem>>, %arg4: memref<1x128xf32, #tpu.memory_space<vmem>>, %arg5: memref<1x128xf32, #tpu.memory_space<vmem>>, %arg6: memref<4x128xbf16, #tpu.memory_space<vmem>>, %arg7: memref<4x128xf32, #tpu.memory_space<vmem>>) attributes {dimension_semantics = [#tpu.dimension_semantics<arbitrary>], iteration_bounds = array<i64: 2>, scalar_prefetch = 0 : i64, scratch_operands = 1 : i64, tpu.core_type = #tpu.core_type<tc>, window_params = [{transform_indices = @transform_0, window_bounds = array<i64: 4, 32, 64>}, {transform_indices = @transform_1, window_bounds = array<i64: 32, 128>}, {pipeline_mode = #tpu.pipeline_mode<synchronous>, transform_indices = @transform_2, window_bounds = array<i64: 1, 128>}, {pipeline_mode = #tpu.pipeline_mode<synchronous>, transform_indices = @transform_3, window_bounds = array<i64: 1, 128>}, {pipeline_mode = #tpu.pipeline_mode<synchronous>, transform_indices = @transform_4, window_bounds = array<i64: 1, 128>}, {pipeline_mode = #tpu.pipeline_mode<synchronous>, transform_indices = @transform_5, window_bounds = array<i64: 4, 128>}]} {
    %c0_i32 = arith.constant 0 : i32
    %0 = arith.cmpi eq, %arg0, %c0_i32 : i32
    %1 = arith.extui %0 : i1 to i32
    %c0_i32_0 = arith.constant 0 : i32
    %2 = arith.cmpi ne, %1, %c0_i32_0 : i32
    scf.if %2 {
      %cst_12 = arith.constant 0.000000e+00 : f32
      %17 = vector.broadcast %cst_12 : f32 to vector<4x128xf32>
      %c0_13 = arith.constant 0 : index
      %c0_14 = arith.constant 0 : index
      %18 = vector.load %arg7[%c0_13, %c0_14] : memref<4x128xf32, #tpu.memory_space<vmem>>, vector<4x128xf32>
      tpu.vector_store %arg7[%c0_13, %c0_14], %17 {strides = array<i32>} : memref<4x128xf32, #tpu.memory_space<vmem>>, vector<4x128xf32>,
    } else {
    }
    %c0 = arith.constant 0 : index
    %c0_1 = arith.constant 0 : index
    %c0_2 = arith.constant 0 : index
    %3 = vector.load %arg1[%c0, %c0_1, %c0_2] : memref<4x32x64xbf16, #tpu.memory_space<vmem>>, vector<4x32x64xbf16>
    %4 = arith.extf %3 : vector<4x32x64xbf16> to vector<4x32x64xf32>
    %cst = arith.constant dense<0.000000e+00> : vector<4x32xf32>
    %5 = vector.multi_reduction <add>, %4, %cst [2] : vector<4x32x64xf32> to vector<4x32xf32>
    %cst_3 = arith.constant 1.562500e-02 : f32
    %6 = vector.broadcast %cst_3 : f32 to vector<4x32xf32>
    %7 = arith.mulf %5, %6 : vector<4x32xf32>
    %c0_4 = arith.constant 0 : index
    %c0_5 = arith.constant 0 : index
    %8 = vector.load %arg7[%c0_4, %c0_5] : memref<4x128xf32, #tpu.memory_space<vmem>>, vector<4x128xf32>
    %9 = arith.truncf %7 : vector<4x32xf32> to vector<4x32xbf16>
    %c0_6 = arith.constant 0 : index
    %c0_7 = arith.constant 0 : index
    %10 = vector.load %arg2[%c0_6, %c0_7] : memref<32x128xbf16, #tpu.memory_space<vmem>>, vector<32x128xbf16>
    %cst_8 = arith.constant dense<0.000000e+00> : vector<4x128xf32>
    %11 = tpu.matmul %9, %10, %cst_8 {dimension_numbers = #tpu.dot_dimension_numbers<[1], [0], [0], [1], [0, 0, 1, 1], [], []>} : vector<4x32xbf16>, vector<32x128xbf16>, vector<4x128xf32> -> vector<4x128xf32>
    %12 = arith.addf %8, %11 : vector<4x128xf32>
    %c0_9 = arith.constant 0 : index
    %c0_10 = arith.constant 0 : index
    %13 = vector.load %arg7[%c0_9, %c0_10] : memref<4x128xf32, #tpu.memory_space<vmem>>, vector<4x128xf32>
    tpu.vector_store %arg7[%c0_9, %c0_10], %12 {strides = array<i32>} : memref<4x128xf32, #tpu.memory_space<vmem>>, vector<4x128xf32>,
    %c1_i32 = arith.constant 1 : i32
    %14 = arith.cmpi eq, %arg0, %c1_i32 : i32
    %15 = arith.extui %14 : i1 to i32
    %c0_i32_11 = arith.constant 0 : i32
    %16 = arith.cmpi ne, %15, %c0_i32_11 : i32
    scf.if %16 {
      %c0_12 = arith.constant 0 : index
      %c0_13 = arith.constant 0 : index
      %17 = vector.load %arg7[%c0_12, %c0_13] : memref<4x128xf32, #tpu.memory_space<vmem>>, vector<4x128xf32>
      %c0_14 = arith.constant 0 : index
      %c0_15 = arith.constant 0 : index
      %18 = vector.load %arg3[%c0_14, %c0_15] : memref<1x128xf32, #tpu.memory_space<vmem>>, vector<1x128xf32>
      %19 = vector.broadcast %18 : vector<1x128xf32> to vector<4x128xf32>
      %20 = arith.addf %17, %19 : vector<4x128xf32>
      %cst_16 = arith.constant dense<0.000000e+00> : vector<128xf32>
      %21 = vector.multi_reduction <add>, %20, %cst_16 [0] : vector<4x128xf32> to vector<128xf32>
      %22 = vector.shape_cast %21 : vector<128xf32> to vector<1x128xf32>
      %cst_17 = arith.constant 4.000000e+00 : f32
      %23 = vector.broadcast %cst_17 : f32 to vector<1x128xf32>
      %24 = arith.divf %22, %23 : vector<1x128xf32>
      %25 = vector.broadcast %24 : vector<1x128xf32> to vector<4x128xf32>
      %26 = arith.subf %20, %25 : vector<4x128xf32>
      %27 = arith.mulf %26, %26 : vector<4x128xf32>
      %cst_18 = arith.constant dense<0.000000e+00> : vector<128xf32>
      %28 = vector.multi_reduction <add>, %27, %cst_18 [0] : vector<4x128xf32> to vector<128xf32>
      %29 = vector.shape_cast %28 : vector<128xf32> to vector<1x128xf32>
      %cst_19 = arith.constant 4.000000e+00 : f32
      %30 = vector.broadcast %cst_19 : f32 to vector<1x128xf32>
      %31 = arith.divf %29, %30 : vector<1x128xf32>
      %32 = vector.broadcast %24 : vector<1x128xf32> to vector<4x128xf32>
      %33 = arith.subf %20, %32 : vector<4x128xf32>
      %cst_20 = arith.constant 9.99999974E-6 : f32
      %34 = vector.broadcast %cst_20 : f32 to vector<1x128xf32>
      %35 = arith.addf %31, %34 : vector<1x128xf32>
      %36 = math.rsqrt %35 : vector<1x128xf32>
      %37 = vector.broadcast %36 : vector<1x128xf32> to vector<4x128xf32>
      %38 = arith.mulf %33, %37 : vector<4x128xf32>
      %c0_21 = arith.constant 0 : index
      %c0_22 = arith.constant 0 : index
      %39 = vector.load %arg4[%c0_21, %c0_22] : memref<1x128xf32, #tpu.memory_space<vmem>>, vector<1x128xf32>
      %40 = vector.broadcast %39 : vector<1x128xf32> to vector<4x128xf32>
      %41 = arith.mulf %38, %40 : vector<4x128xf32>
      %c0_23 = arith.constant 0 : index
      %c0_24 = arith.constant 0 : index
      %42 = vector.load %arg5[%c0_23, %c0_24] : memref<1x128xf32, #tpu.memory_space<vmem>>, vector<1x128xf32>
      %43 = vector.broadcast %42 : vector<1x128xf32> to vector<4x128xf32>
      %44 = arith.addf %41, %43 : vector<4x128xf32>
      %45 = arith.mulf %44, %44 : vector<4x128xf32>
      %cst_25 = arith.constant dense<0.000000e+00> : vector<4xf32>
      %46 = vector.multi_reduction <add>, %45, %cst_25 [1] : vector<4x128xf32> to vector<4xf32>
      %47 = vector.shape_cast %46 : vector<4xf32> to vector<4x1xf32>
      %cst_26 = arith.constant 1.000000e-24 : f32
      %48 = vector.broadcast %cst_26 : f32 to vector<4x1xf32>
      %49 = arith.maximumf %47, %48 : vector<4x1xf32>
      %50 = math.rsqrt %49 : vector<4x1xf32>
      %51 = vector.broadcast %50 : vector<4x1xf32> to vector<4x128xf32>
      %52 = arith.mulf %44, %51 : vector<4x128xf32>
      %53 = arith.truncf %52 : vector<4x128xf32> to vector<4x128xbf16>
      %c0_27 = arith.constant 0 : index
      %c0_28 = arith.constant 0 : index
      %54 = vector.load %arg6[%c0_27, %c0_28] : memref<4x128xbf16, #tpu.memory_space<vmem>>, vector<4x128xbf16>
      tpu.vector_store %arg6[%c0_27, %c0_28], %53 {strides = array<i32>} : memref<4x128xbf16, #tpu.memory_space<vmem>>, vector<4x128xbf16>,
    } else {
    }
    return
  }
  func.func @transform_0(%arg0: i32) -> (i32, i32, i32) {
    %c0_i32 = arith.constant 0 : i32
    %c0_i32_0 = arith.constant 0 : i32
    %c0_i32_1 = arith.constant 0 : i32
    return %c0_i32, %arg0, %c0_i32_0 : i32, i32, i32
  }
  func.func @transform_1(%arg0: i32) -> (i32, i32) {
    %c0_i32 = arith.constant 0 : i32
    %c0_i32_0 = arith.constant 0 : i32
    return %arg0, %c0_i32 : i32, i32
  }
  func.func @transform_2(%arg0: i32) -> (i32, i32) {
    %c0_i32 = arith.constant 0 : i32
    %c0_i32_0 = arith.constant 0 : i32
    %c0_i32_1 = arith.constant 0 : i32
    return %c0_i32, %c0_i32_0 : i32, i32
  }
  func.func @transform_3(%arg0: i32) -> (i32, i32) {
    %c0_i32 = arith.constant 0 : i32
    %c0_i32_0 = arith.constant 0 : i32
    %c0_i32_1 = arith.constant 0 : i32
    return %c0_i32, %c0_i32_0 : i32, i32
  }
  func.func @transform_4(%arg0: i32) -> (i32, i32) {
    %c0_i32 = arith.constant 0 : i32
    %c0_i32_0 = arith.constant 0 : i32
    %c0_i32_1 = arith.constant 0 : i32
    return %c0_i32, %c0_i32_0 : i32, i32
  }
  func.func @transform_5(%arg0: i32) -> (i32, i32) {
    %c0_i32 = arith.constant 0 : i32
    %c0_i32_0 = arith.constant 0 : i32
    %c0_i32_1 = arith.constant 0 : i32
    return %c0_i32, %c0_i32_0 : i32, i32
  }
}

module attributes {stable_mosaic.version = 11 : i64} {
  func.func @arcface_kernel(%arg0: i32, %arg1: memref<4x128xbf16, #tpu.memory_space<vmem>>, %arg2: memref<4x1xi32, #tpu.memory_space<vmem>>, %arg3: memref<1x128xf32, #tpu.memory_space<vmem>>, %arg4: memref<128x128xbf16, #tpu.memory_space<vmem>>, %arg5: memref<4x128xf32, #tpu.memory_space<vmem>>) attributes {dimension_semantics = [#tpu.dimension_semantics<parallel>], iteration_bounds = array<i64: 2>, scalar_prefetch = 0 : i64, scratch_operands = 0 : i64, tpu.core_type = #tpu.core_type<tc>, window_params = [{pipeline_mode = #tpu.pipeline_mode<synchronous>, transform_indices = @transform_0, window_bounds = array<i64: 4, 128>}, {pipeline_mode = #tpu.pipeline_mode<synchronous>, transform_indices = @transform_1, window_bounds = array<i64: 4, 1>}, {transform_indices = @transform_2, window_bounds = array<i64: 1, 128>}, {transform_indices = @transform_3, window_bounds = array<i64: 128, 128>}, {transform_indices = @transform_4, window_bounds = array<i64: 4, 128>}]} {
    %c0 = arith.constant 0 : index
    %c0_0 = arith.constant 0 : index
    %0 = vector.load %arg1[%c0, %c0_0] : memref<4x128xbf16, #tpu.memory_space<vmem>>, vector<4x128xbf16>
    %c0_1 = arith.constant 0 : index
    %c0_2 = arith.constant 0 : index
    %1 = vector.load %arg4[%c0_1, %c0_2] : memref<128x128xbf16, #tpu.memory_space<vmem>>, vector<128x128xbf16>
    %cst = arith.constant dense<0.000000e+00> : vector<4x128xf32>
    %2 = tpu.matmul %0, %1, %cst {dimension_numbers = #tpu.dot_dimension_numbers<[1], [1], [0], [0], [0, 0, 1, 0], [], []>} : vector<4x128xbf16>, vector<128x128xbf16>, vector<4x128xf32> -> vector<4x128xf32>
    %c0_3 = arith.constant 0 : index
    %c0_4 = arith.constant 0 : index
    %3 = vector.load %arg3[%c0_3, %c0_4] : memref<1x128xf32, #tpu.memory_space<vmem>>, vector<1x128xf32>
    %4 = vector.broadcast %3 : vector<1x128xf32> to vector<4x128xf32>
    %5 = arith.mulf %2, %4 : vector<4x128xf32>
    %6 = arith.mulf %5, %5 : vector<4x128xf32>
    %cst_5 = arith.constant 1.000000e+00 : f32
    %7 = vector.broadcast %cst_5 : f32 to vector<4x128xf32>
    %8 = arith.subf %7, %6 : vector<4x128xf32>
    %cst_6 = arith.constant 0.000000e+00 : f32
    %cst_7 = arith.constant 1.000000e+00 : f32
    %9 = vector.broadcast %cst_6 : f32 to vector<4x128xf32>
    %10 = arith.maximumf %9, %8 : vector<4x128xf32>
    %11 = vector.broadcast %cst_7 : f32 to vector<4x128xf32>
    %12 = arith.minimumf %11, %10 : vector<4x128xf32>
    %13 = math.sqrt %12 : vector<4x128xf32>
    %cst_8 = arith.constant 0.87758255 : f32
    %14 = vector.broadcast %cst_8 : f32 to vector<4x128xf32>
    %15 = arith.mulf %5, %14 : vector<4x128xf32>
    %cst_9 = arith.constant 0.47942555 : f32
    %16 = vector.broadcast %cst_9 : f32 to vector<4x128xf32>
    %17 = arith.mulf %13, %16 : vector<4x128xf32>
    %18 = arith.subf %15, %17 : vector<4x128xf32>
    %cst_10 = arith.constant -0.87758255 : f32
    %19 = vector.broadcast %cst_10 : f32 to vector<4x128xf32>
    %20 = arith.cmpf ogt, %5, %19 : vector<4x128xf32>
    %cst_11 = arith.constant 0.239712775 : f32
    %21 = vector.broadcast %cst_11 : f32 to vector<4x128xf32>
    %22 = arith.subf %5, %21 : vector<4x128xf32>
    %23 = arith.select %20, %18, %22 : vector<4x128xi1>, vector<4x128xf32>
    %24 = tpu.iota {dimensions = array<i32: 1>} : vector<4x128xi32>
    %c128_i32 = arith.constant 128 : i32
    %25 = arith.muli %arg0, %c128_i32 : i32
    %26 = vector.broadcast %25 : i32 to vector<4x128xi32>
    %27 = arith.addi %24, %26 : vector<4x128xi32>
    %c0_12 = arith.constant 0 : index
    %c0_13 = arith.constant 0 : index
    %28 = vector.load %arg2[%c0_12, %c0_13] : memref<4x1xi32, #tpu.memory_space<vmem>>, vector<4x1xi32>
    %29 = vector.broadcast %28 : vector<4x1xi32> to vector<4x128xi32>
    %30 = arith.cmpi eq, %27, %29 : vector<4x128xi32>
    %31 = arith.select %30, %23, %5 : vector<4x128xi1>, vector<4x128xf32>
    %cst_14 = arith.constant 3.000000e+01 : f32
    %32 = vector.broadcast %cst_14 : f32 to vector<4x128xf32>
    %33 = arith.mulf %31, %32 : vector<4x128xf32>
    %c0_15 = arith.constant 0 : index
    %c0_16 = arith.constant 0 : index
    %34 = vector.load %arg5[%c0_15, %c0_16] : memref<4x128xf32, #tpu.memory_space<vmem>>, vector<4x128xf32>
    tpu.vector_store %arg5[%c0_15, %c0_16], %33 {strides = array<i32>} : memref<4x128xf32, #tpu.memory_space<vmem>>, vector<4x128xf32>,
    return
  }
  func.func @transform_0(%arg0: i32) -> (i32, i32) {
    %c0_i32 = arith.constant 0 : i32
    %c0_i32_0 = arith.constant 0 : i32
    %c0_i32_1 = arith.constant 0 : i32
    return %c0_i32, %c0_i32_0 : i32, i32
  }
  func.func @transform_1(%arg0: i32) -> (i32, i32) {
    %c0_i32 = arith.constant 0 : i32
    %c0_i32_0 = arith.constant 0 : i32
    %c0_i32_1 = arith.constant 0 : i32
    return %c0_i32, %c0_i32_0 : i32, i32
  }
  func.func @transform_2(%arg0: i32) -> (i32, i32) {
    %c0_i32 = arith.constant 0 : i32
    %c0_i32_0 = arith.constant 0 : i32
    return %c0_i32, %arg0 : i32, i32
  }
  func.func @transform_3(%arg0: i32) -> (i32, i32) {
    %c0_i32 = arith.constant 0 : i32
    %c0_i32_0 = arith.constant 0 : i32
    return %arg0, %c0_i32 : i32, i32
  }
  func.func @transform_4(%arg0: i32) -> (i32, i32) {
    %c0_i32 = arith.constant 0 : i32
    %c0_i32_0 = arith.constant 0 : i32
    return %c0_i32, %arg0 : i32, i32
  }
}

</mosaic_0001>

<bundles_post_ra>
// kernel: imgnet_forward.3
= control target key start
LH: loop header
LB: loop body
LE: loop exit
PB: predicated region body
PF: predicated region fallthrough
CT: control target
= control target key end

     0   :  { %9 = vsyncpa [#allocation3], 0  ;;  %s697_s0 = inlined_call_operand.vmem [shape: bf16[4,128], index: 0, kind: input, shape index: {}]   ;;  %s698_s1 = inlined_call_operand.vmem [shape: s32[4,1], index: 1, kind: input, shape index: {}]   ;;  %s699_s2 = inlined_call_operand.vmem [shape: f32[1,256], index: 2, kind: input, shape index: {}]   ;;  %s700_s3 = inlined_call_operand.vmem [shape: bf16[256,128], index: 3, kind: input, shape index: {}]   ;;  %s701_s4 = inlined_call_operand.hbm [shape: f32[4,256], index: 4, kind: output, shape index: {}]  }
   0x1   :  { %11 = vsyncpa [#allocation3 + $0x1], 0  ;;  %s601_s15 = smov 0   ;;  %s603_s16 = smov 0  }
   0x2   :  { %s605_s17 = smov 0   ;;  %s607_s18 = smov 0  }
   0x3 LB: > { %s622_s19 = sadd.s32 4294967295, %s573_s18   ;;  %s414_s20 = sadd.s32 4294967294, %s573_s18   ;;  %s573_s18 = sphi %s607_s18, %s707_s18   ;;  %s569_s17 = sphi %s605_s17, %s706_s17   ;;  %s565_s16 = sphi %s603_s16, %s705_s16   ;;  %s561_s15 = sphi %s601_s15, %s704_s15  }
   0x4   : > { %s626_s21 = sadd.s32 1, %s573_s18   ;;  %s118_s22 = sadd.s32 1, %s569_s17 }
   0x5   : > { %s115_s23 = ssub.s32 %s573_s18, %s626_s21  ;;  %p128_p0 = scmp.ne.s32.totalorder %s569_s17, %s565_s16 }
   0x6   : > { %p116_p1 = scmp.eq.s32.totalorder %s115_s23, 0  ;;  %p129_p2 = scmp.eq.s32.totalorder %s622_s19, 1 }
   0x7   : > { %p134_p3 = scmp.ne.s32.totalorder %s565_s16, %s561_s15  ;;  %p135_p4 = scmp.eq.s32.totalorder %s414_s20, 1 }
   0x8   : > { %s637_s24 = scalar_select %p116_p1, %s569_s17, %s118_s22  }
   0x9   : > { %p639_p5 = por %p129_p2, %p128_p0  ;;  %p643_p6 = por %p135_p4, %p134_p3 }
   0xa   : > { %p417_p7 = scmp.ge.s32.totalorder %s573_s18, 1  ;;  %p174_p8 = scmp.lt.s32.totalorder %s573_s18, 3 }
   0xc   : > { %p175_p9 = pnand %p417_p7, %p174_p8 }
   0xd   : > { %s419_s27 = sshll.u32 (!%p175_p9), %s622_s19, 4  ;;  %p203_p10 = scmp.lt.s32.totalorder (!%p175_p9), %s622_s19, 1 }
   0xe   : > { %178 = sbr.rel (%p175_p9) target bundleno = 255 (0xff), region = 36  ;;  %p207_p11 = scmp.lt.s32.totalorder (!%p175_p9), %s419_s27, 31 }
   0xf   : > { %s454_s14 = sshll.u32 (!%p175_p9), %s622_s19, 7  ;;  %s200_s20 = sand.u32 (!%p175_p9), 1, %s565_s16  }
  0x10   : > { %s418_s22 = sshll.u32 (!%p175_p9), %s200_s20, 2  ;;  %s456_s23 = sshll.u32 (!%p175_p9), %s622_s19, 2 }
  0x11   : > { %s341_s29 = scalar_lea.hbm (!%p175_p9), %s701_s4, %s456_s23  ;;  %s202_s30 = scalar_lea.vmem (!%p175_p9), [#allocation2], %s418_s22 }
  0x12   : > { %s531_s11 = scalar_lea.hbm (!%p175_p9), %s701_s4, 8 }
  0x13   : > { %s204_s28 = scalar_select %p203_p10, %s622_s19, 1  ;;  %v322_v5 = vld [vmem:[%s698_s1] sm:$0xf]  ;;  %v575_v6 = vmov 0   ;;  %v317_v23 = vlaneseq  ;;  %v320_v27 = vstv %s454_s14 }
  0x14   : > { %s709_s27 = smov (!%p207_p11, %s419_s27), 31  ;;  %507 = vset.pattern.permute.xlu0 %v575_v6  ;;  %v212_v10 = vld [vmem:[%s697_s0] sm:$0x3]  ;;  %s331_s19 = scalar_lea.sflag [#allocation3], %s200_s20 }
  0x15   : > { %s205_s5 = scalar_lea.vmem %s699_s2, %s204_s28  ;;  %s420_s6 = sshll.u32 %s709_s27, 2  ;;  %324 = vperm.xlu0 %507, %v322_v5   ;;  %v318_v26 = vand.u32 127, %v317_v23 }
  0x16   : > { %s210_s9 = scalar_lea.vmem %s700_s3, %s420_s6  ;;  %v508_v11 = vld [vmem:[%s205_s5] ss:$0 sm:$0xff]  ;;  %s343_s5 = sshll.u32 %s202_s30, 4  ;;  %s344_s5 = int_to_ptr.vmem [resolvable:$true] %s343_s5 }
  0x17   : > { %v466_v0 = vld [vmem:[%s210_s9 + $0x38] sm:$0xff]  ;;  %v465_v1 = vld [vmem:[%s210_s9 + $0x30] sm:$0xff]  ;;  %v464_v2 = vld [vmem:[%s210_s9 + $0x28] sm:$0xff]  ;;  %v321_v31 = vadd.s32 %v320_v27, %v318_v26  ;;  %s345_s6 = sshll.u32 %s341_s29, 4  ;;  %s346_s6 = int_to_ptr.hbm [resolvable:$true] %s345_s6 }
  0x18   : > { %277 = vmatpush.bf16.xpose.msra.mxu0 %v466_v0  ;;  %v463_v3 = vld [vmem:[%s210_s9 + $0x20] sm:$0xff]  ;;  %v462_v4 = vld [vmem:[%s210_s9 + $0x18] sm:$0xff]  ;;  %v461_v7 = vld [vmem:[%s210_s9 + $0x10] sm:$0xff]  ;;  %s525_s7 = sshra.s32 %s346_s6, 4  ;;  %s526_s7 = int_to_ptr.hbm [resolvable:$true] %s525_s7 }
  0x19   : > { %v460_v8 = vld [vmem:[%s210_s9 + $0x8] sm:$0xff]  ;;  %v459_v9 = vld [vmem:[%s210_s9] sm:$0xff]  ;;  %s527_s8 = scalar_lea.hbm %s526_s7, 4  ;;  %p532_p1 = scmp.lt.s32.totalorder %s526_s7, %s701_s4 }
  0x1a   : > { %p528_p12 = scmp.ne.s32.totalorder %s526_s7, %s527_s8  ;;  %p533_p2 = scmp.lt.s32.totalorder %s531_s11, %s527_s8 }
  0x1c   : > { %p529_p13 = pnand %p528_p12, %p639_p5  ;;  %p534_p3 = por %p533_p2, %p532_p1 }
  0x1e   : > { %p530_p0 = pneg %p529_p13 }
  0x20   : > { %278 = vmatpush.bf16.xpose.msra.mxu0 %v465_v1  ;;  %p535_p4 = pnand %p534_p3, %p530_p0 }
  0x28   : > { %279 = vmatpush.bf16.xpose.msra.mxu0 %v464_v2 }
  0x30   : > { %280 = vmatpush.bf16.xpose.msra.mxu0 %v463_v3 }
  0x38   : > { %281 = vmatpush.bf16.xpose.msra.mxu0 %v462_v4 }
  0x40   : > { %282 = vmatpush.bf16.xpose.msra.mxu0 %v461_v7 }
  0x48   : > { %283 = vmatpush.bf16.xpose.msra.mxu0 %v460_v8 }
  0x50   : > { %284 = vmatpush.bf16.xpose.msra.mxu0 %v459_v9 }
  0x57   : > { %285 = vmatmul.bf16.vlgmr.msra.gmra.mxu0 %v212_v10 }
  0x87   : > { %v325_v32 = vpop.permute.xlu0 %324 }
  0x88   : > { %vm326_vm2 = vcmp.eq.s32.totalorder %v321_v31, %v325_v32 }
  0xd4   : > { %v286_v12 = vpop.f32.mrf.mxu0 }
  0xd5   : > { %v294_v13 = vmul.f32 %v508_v11, %v286_v12 }
  0xd7   : > { %v295_v14 = vmul.f32 %v294_v13, %v294_v13  ;;  %v311_v34 = vmul.f32 0.87758255, %v294_v13  ;;  %v453_v37 = vadd.f32 -0.23971277, %v294_v13  ;;  %vm314_vm3 = vcmp.gt.f32.partialorder %v294_v13, -0.87758255 }
  0xd9   : > { %v296_v15 = vsub.f32 1.0, %v295_v14 }
  0xdb   : > { %v297_v16 = vmax.f32 %v296_v15, 0.0 }
  0xdc   : > { %v288_v17 = vpop.f32.mrf.mxu0 }
  0xdd   : > { %v298_v18 = vmin.f32 %v297_v16, 1.0 }
  0xdf   : > { %509 = vrsqrt.f32 %v298_v18  ;;  %vm306_vm0 = vcmp.eq.f32.partialorder %v298_v18, inf  ;;  %v309_v29 = vand.u32 2147483648, %v298_v18  ;;  %vm308_vm1 = vcmp.eq.f32.partialorder %v298_v18, 0.0 }
  0xe5   : > { %v510_v19 = vpop.eup %509 }
  0xe6   : > { %v300_v20 = vmul.f32 %v510_v19, %v298_v18 }
  0xe8   : > { %v301_v21 = vmul.f32 %v510_v19, %v300_v20 }
  0xea   : > { %v302_v22 = vmul.f32 0.5, %v301_v21 }
  0xec   : > { %v303_v24 = vsub.f32 1.5, %v302_v22 }
  0xee   : > { %v304_v25 = vmul.f32 %v510_v19, %v303_v24 }
  0xf0   : > { %v305_v28 = vmul.f32 %v304_v25, %v298_v18 }
  0xf2   : > { %v307_v30 = vsel %vm306_vm0, %v298_v18, %v305_v28 }
  0xf3   : > { %v310_v33 = vsel %vm308_vm1, %v309_v29, %v307_v30 }
  0xf4   : > { %v312_v35 = vmul.f32 0.47942555, %v310_v33 }
  0xf6   : > { %v313_v36 = vsub.f32 %v311_v34, %v312_v35 }
  0xf8   : > { %v316_v38 = vsel %vm314_vm3, %v313_v36, %v453_v37 }
  0xf9   : > { %v327_v39 = vsel %vm326_vm2, %v316_v38, %v294_v13 }
  0xfa   : > { %v328_v40 = vmul.f32 30.0, %v327_v39 }
  0xfc   : > { %329 = vst [vmem:[%s202_s30] sm:$0xf] %v328_v40 }
  0xfd   : > { %538 = shalt.err (!%p535_p4)
}
  0xfe   : > { %467 = dma.vmem_to_hbm [thread:$0]  (%p639_p5), %s344_s5, 64, %s346_s6, %s331_s19  }
  0xff PF: > { %p473_p7 = scmp.ge.s32.totalorder %s573_s18, 2  ;;  %s357_s14 = sand.u32 1, %s561_s15  }
 0x100   : > { %s358_s20 = scalar_lea.sflag [#allocation3], %s357_s14 }
 0x101   : > { %p470_p8 = pnand %p473_p7, %p643_p6 }
 0x103   : > { %p471_p9 = pneg %p470_p8 }
 0x105   : > { %556 = dma.done.wait (%p471_p9), %s358_s20, 64  }
 0x106   : > { %558 = vsyncadd (%p471_p9), %s358_s20, 4294967232  ;;  %p14_p10 = scmp.ge.s32.totalorder %s626_s21, 4   ;;  %s704_s15 = smov %s565_s16 }
 0x107   : > { %s705_s16 = smov %s569_s17  ;;  %s706_s17 = smov %s637_s24 }
 0x108   : > { %s707_s18 = smov %s626_s21  ;;  %16 = sbr.rel (!%p14_p10) target bundleno = 3 (0x3), region = 74 }
 0x10d   :  { %364 = vsyncpa [#allocation3], 1 }
 0x10e   :  { %366 = vsyncpa [#allocation3 + $0x1], 1 }

// kernel: imgnet_forward.2
= control target key start
LH: loop header
LB: loop body
LE: loop exit
PB: predicated region body
PF: predicated region fallthrough
CT: control target
= control target key end

     0   :  { %s829_s18 = smov 0   ;;  %s831_s19 = smov 0   ;;  %s937_s0 = inlined_call_operand.vmem [shape: bf16[4,64,64], index: 0, kind: input, shape index: {}]   ;;  %s938_s1 = inlined_call_operand.vmem [shape: bf16[64,128], index: 1, kind: input, shape index: {}]   ;;  %s939_s2 = inlined_call_operand.vmem [shape: f32[1,128], index: 2, kind: input, shape index: {}]   ;;  %s940_s3 = inlined_call_operand.vmem [shape: f32[1,128], index: 3, kind: input, shape index: {}]   ;;  %s941_s4 = inlined_call_operand.vmem [shape: f32[1,128], index: 4, kind: input, shape index: {}]   ;;  %s942_s5 = inlined_call_operand.vmem [shape: bf16[4,128], index: 5, kind: output, shape index: {}]  }
   0x1   :  { %s833_s20 = smov 0  }
   0x2 LB: > { %s845_s21 = sadd.s32 4294967295, %s795_s20   ;;  %s848_s22 = sadd.s32 1, %s795_s20   ;;  %s795_s20 = sphi %s833_s20, %s945_s20   ;;  %s791_s19 = sphi %s831_s19, %s944_s19   ;;  %s787_s18 = sphi %s829_s18, %s943_s18  }
   0x3   : > { %s19_s23 = ssub.s32 %s795_s20, %s848_s22  ;;  %s22_s24 = sadd.s32 1, %s791_s19 }
   0x4   : > { %p20_p0 = scmp.eq.s32.totalorder %s19_s23, 0  ;;  %p29_p1 = scmp.ne.s32.totalorder %s791_s19, %s787_s18 }
   0x5   : > { %p30_p2 = scmp.eq.s32.totalorder %s795_s20, 0  ;;  %p675_p4 = scmp.ge.s32.totalorder %s795_s20, 2 }
   0x6   : > { %s857_s25 = scalar_select %p20_p0, %s791_s19, %s22_s24  }
   0x7   : > { %p31_p3 = por %p30_p2, %p29_p1  ;;  %174 = sbr.rel (%p675_p4) target bundleno = 24 (0x18), region = 28 }
   0xc   : > { %177 = sbr.rel (!%p31_p3) target bundleno = 24 (0x18), region = 32  ;;  %s179_s26 = sand.u32 (%p31_p3), 1, %s791_s19  }
   0xd   : > { %s696_s27 = sshll.u32 (%p31_p3), %s795_s20, 4  ;;  %s676_s28 = sshll.u32 (%p31_p3), %s179_s26, 6 }
   0xe   : > { %s184_s6 = scalar_lea.vmem (%p31_p3), %s937_s0, %s696_s27  ;;  %s181_s7 = scalar_lea.vmem (%p31_p3), [#allocation3], %s676_s28 }
   0xf   : > { %v201_v0 = vld [vmem:[%s184_s6] sm:$0xff] (%p31_p3)   ;;  %v205_v1 = vld [vmem:[%s184_s6 + $0x8] sm:$0xff] (%p31_p3)  }
  0x10   : > { %v209_v2 = vld [vmem:[%s184_s6 + $0x20] sm:$0xff] (%p31_p3)   ;;  %202 = vst [vmem:[%s181_s7] sm:$0xff] (%p31_p3), %v201_v0   ;;  %v213_v3 = vld [vmem:[%s184_s6 + $0x28] sm:$0xff] (%p31_p3)  }
  0x11   : > { %206 = vst [vmem:[%s181_s7 + $0x8] sm:$0xff] %v205_v1   ;;  %v217_v4 = vld [vmem:[%s184_s6 + $0x40] sm:$0xff]   ;;  %v221_v5 = vld [vmem:[%s184_s6 + $0x48] sm:$0xff]  }
  0x12   : > { %210 = vst [vmem:[%s181_s7 + $0x10] sm:$0xff] %v209_v2   ;;  %v225_v6 = vld [vmem:[%s184_s6 + $0x60] sm:$0xff]   ;;  %v229_v7 = vld [vmem:[%s184_s6 + $0x68] sm:$0xff]  }
  0x13   : > { %214 = vst [vmem:[%s181_s7 + $0x18] sm:$0xff] %v213_v3  }
  0x14   : > { %218 = vst [vmem:[%s181_s7 + $0x20] sm:$0xff] %v217_v4  }
  0x15   : > { %222 = vst [vmem:[%s181_s7 + $0x28] sm:$0xff] %v221_v5  }
  0x16   : > { %226 = vst [vmem:[%s181_s7 + $0x30] sm:$0xff] %v225_v6  }
  0x17   : > { %230 = vst [vmem:[%s181_s7 + $0x38] sm:$0xff] %v229_v7  }
  0x18 PF: > { %p679_p5 = scmp.ge.s32.totalorder %s795_s20, 1  ;;  %p296_p6 = scmp.lt.s32.totalorder %s795_s20, 3 }
  0x1a   : > { %p297_p7 = pnand %p679_p5, %p296_p6 }
  0x1b   : > { %s303_s8 = sand.u32 (!%p297_p7), 1, %s787_s18   ;;  %s681_s9 = sshll.u32 (!%p297_p7), %s845_s21, 2 }
  0x1c   : > { %300 = sbr.rel (%p297_p7) target bundleno = 556 (0x22c), region = 77  ;;  %s680_s10 = sshll.u32 (!%p297_p7), %s303_s8, 6 }
  0x1d   : > { %p332_p8 = scmp.lt.s32.totalorder (!%p297_p7), %s681_s9, 7  ;;  %s874_s15 = scalar_lea.vmem (!%p297_p7), [#allocation3], %s680_s10 }
  0x1e   : > { %p683_p9 = scmp.ne.s32.totalorder (!%p297_p7), %s845_s21, 0 }
  0x21   : > { %s947_s9 = smov (!%p332_p8, %s681_s9), 7  ;;  %341 = sbr.rel (%p683_p9) target bundleno = 40 (0x28), region = 85 }
  0x22   : > { %s682_s11 = sshll.u32 %s947_s9, 2 }
  0x23   : > { %s872_s14 = scalar_lea.vmem %s938_s1, %s682_s11 }
  0x26   : > { %v797_v8 = vmov 0.0  }
  0x27   : > { %342 = vst [vmem:[#allocation2] sm:$0xf] %v797_v8 }
  0x28 PF: > { %v732_v9 = vld [vmem:[%s874_s15 + $0x10] sm:$0xff]   ;;  %vm375_vm0 = vcmask 523264   ;;  %v731_v10 = vld [vmem:[%s874_s15 + $0x8] sm:$0xff]   ;;  %v700_v11 = vld [vmem:[%s874_s15] sm:$0xff]   ;;  %v477_v3 = vlaneseq  ;;  %vm482_vm1 = vcmask 130112   ;;  %vm486_vm2 = vcmask 195712  }
  0x29   : > { %v709_v12 = vunpack.c.l.bf16 %v732_v9  ;;  %v705_v13 = vunpack.c.l.bf16 %v731_v10  ;;  %v701_v14 = vunpack.c.l.bf16 %v700_v11  ;;  %v710_v18 = vunpack.c.h.bf16 %v732_v9  ;;  %v733_v24 = vld [vmem:[%s874_s15 + $0x18] sm:$0xff]   ;;  %v734_v25 = vld [vmem:[%s874_s15 + $0x20] sm:$0xff]   ;;  %v735_v32 = vld [vmem:[%s874_s15 + $0x28] sm:$0xff]   ;;  %p693_p10 = scmp.ne.s32.totalorder %s845_s21, 1 }
  0x2a   : > { %v706_v19 = vunpack.c.h.bf16 %v731_v10  ;;  %v702_v20 = vunpack.c.h.bf16 %v700_v11  ;;  %v714_v26 = vunpack.c.h.bf16 %v733_v24  ;;  %v717_v27 = vunpack.c.l.bf16 %v734_v25  ;;  %v736_v39 = vld [vmem:[%s874_s15 + $0x30] sm:$0xff]   ;;  %v737_v40 = vld [vmem:[%s874_s15 + $0x38] sm:$0xff]   ;;  %v698_v55 = vld [vmem:[%s872_s14 + $0x8] sm:$0xff] }
  0x2b   : > { %v388_v15 = vsel %vm375_vm0, %v709_v12, 0.0  ;;  %v382_v16 = vsel %vm375_vm0, %v705_v13, 0.0  ;;  %v376_v17 = vsel %vm375_vm0, %v701_v14, 0.0  ;;  %v391_v21 = vsel %vm375_vm0, %v710_v18, 0.0  ;;  %542 = vmatpush.bf16.msra.mxu0 %v698_v55  ;;  %v697_v58 = vld [vmem:[%s872_s14] sm:$0xff] }
  0x2c   : > { %389 = vadd.xlane.f32.xlu1 %v388_v15  ;;  %383 = vadd.xlane.f32.xlu2 %v382_v16  ;;  %v385_v22 = vsel %vm375_vm0, %v706_v19, 0.0  ;;  %v379_v23 = vsel %vm375_vm0, %v702_v20, 0.0  ;;  %v713_v28 = vunpack.c.l.bf16 %v733_v24  ;;  %v397_v29 = vsel %vm375_vm0, %v714_v26, 0.0 }
  0x2d   : > { %377 = vadd.xlane.f32.xlu0 %v376_v17  ;;  %v400_v30 = vsel %vm375_vm0, %v717_v27, 0.0  ;;  %v721_v33 = vunpack.c.l.bf16 %v735_v32  ;;  %v722_v34 = vunpack.c.h.bf16 %v735_v32  ;;  %v718_v35 = vunpack.c.h.bf16 %v734_v25 }
  0x2e   : > { %v394_v31 = vsel %vm375_vm0, %v713_v28, 0.0  ;;  %v726_v41 = vunpack.c.h.bf16 %v736_v39  ;;  %v729_v42 = vunpack.c.l.bf16 %v737_v40  ;;  %v725_v43 = vunpack.c.l.bf16 %v736_v39 }
  0x2f   : > { %v406_v36 = vsel %vm375_vm0, %v721_v33, 0.0  ;;  %v409_v37 = vsel %vm375_vm0, %v722_v34, 0.0  ;;  %v403_v38 = vsel %vm375_vm0, %v718_v35, 0.0  ;;  %v730_v47 = vunpack.c.h.bf16 %v737_v40  ;;  %543 = vmatpush.bf16.msra.mxu0 %v697_v58 }
  0x30   : > { %v415_v44 = vsel %vm375_vm0, %v726_v41, 0.0  ;;  %v418_v45 = vsel %vm375_vm0, %v729_v42, 0.0  ;;  %v412_v46 = vsel %vm375_vm0, %v725_v43, 0.0  ;;  %v478_v14 = vand.u32 127, %v477_v3 }
  0x31   : > { %v421_v48 = vsel %vm375_vm0, %v730_v47, 0.0  ;;  %vm490_vm3 = vcmask 261312   ;;  %vm513_vm4 = vcmask 1041409   ;;  %vm515_vm5 = vcmask 1042434  }
  0x32   : > { %v480_v26 = vadd.s32 4294967288, %v478_v14  ;;  %vm517_vm6 = vcmask 1043459   ;;  %vm532_vm7 = vcmask 261120  }
  0x34   : > { %392 = vadd.xlane.f32.xlu1 %v391_v21  ;;  %386 = vadd.xlane.f32.xlu2 %v385_v22 }
  0x35   : > { %380 = vadd.xlane.f32.xlu0 %v379_v23 }
  0x3c   : > { %398 = vadd.xlane.f32.xlu1 %v397_v29  ;;  %401 = vadd.xlane.f32.xlu2 %v400_v30 }
  0x3d   : > { %395 = vadd.xlane.f32.xlu0 %v394_v31  ;;  %v484_v31 = vadd.s32 4294967280, %v478_v14 }
  0x44   : > { %407 = vadd.xlane.f32.xlu1 %v406_v36  ;;  %410 = vadd.xlane.f32.xlu2 %v409_v37 }
  0x45   : > { %404 = vadd.xlane.f32.xlu0 %v403_v38 }
  0x4c   : > { %416 = vadd.xlane.f32.xlu1 %v415_v44  ;;  %419 = vadd.xlane.f32.xlu2 %v418_v45 }
  0x4d   : > { %413 = vadd.xlane.f32.xlu0 %v412_v46  ;;  %v488_v46 = vadd.s32 4294967272, %v478_v14 }
  0x55   : > { %422 = vadd.xlane.f32.xlu0 %v421_v48 }
  0x9f   : > { %v390_v49 = vpop.xlane.xlu1 %389  ;;  %v384_v50 = vpop.xlane.xlu2 %383 }
  0xa0   : > { %v378_v51 = vpop.xlane.xlu0 %377  ;;  %v428_v62 = vmul.f32 0.015625, %v390_v49  ;;  %v426_v5 = vmul.f32 0.015625, %v384_v50 }
  0xa1   : > { %v424_v8 = vmul.f32 0.015625, %v378_v51 }
  0xa7   : > { %v393_v52 = vpop.xlane.xlu1 %392  ;;  %v387_v53 = vpop.xlane.xlu2 %386 }
  0xa8   : > { %v381_v54 = vpop.xlane.xlu0 %380  ;;  %v429_v63 = vmul.f32 0.015625, %v393_v52  ;;  %v427_v9 = vmul.f32 0.015625, %v387_v53 }
  0xa9   : > { %v425_v4 = vmul.f32 0.015625, %v381_v54 }
  0xaa   : > { %v443_v12 = vpack.c.bf16 %v429_v63, %v428_v62  ;;  %v442_v18 = vpack.c.bf16 %v427_v9, %v426_v5 }
  0xab   : > { %v441_v15 = vpack.c.bf16 %v425_v4, %v424_v8 }
  0xac   : > { %v465_v22 = vunpack.c.l.b16 %v443_v12  ;;  %v466_v27 = vunpack.c.h.b16 %v443_v12  ;;  %v463_v36 = vunpack.c.l.b16 %v442_v18  ;;  %v464_v55 = vunpack.c.h.b16 %v442_v18 }
  0xad   : > { %v461_v28 = vunpack.c.l.b16 %v441_v15  ;;  %v462_v29 = vunpack.c.h.b16 %v441_v15 }
  0xae   : > { %v492_v35 = vperm.slane %v465_v22, %v478_v14  ;;  %v493_v39 = vperm.slane %v466_v27, %v480_v26  ;;  %v485_v51 = vperm.slane %v463_v36, %v484_v31  ;;  %v489_v3 = vperm.slane %v464_v55, %v488_v46 }
  0xaf   : > { %v399_v56 = vpop.xlane.xlu1 %398  ;;  %v402_v57 = vpop.xlane.xlu2 %401  ;;  %v479_v40 = vperm.slane %v461_v28, %v478_v14  ;;  %v481_v41 = vperm.slane %v462_v29, %v480_v26 }
  0xb0   : > { %v396_v59 = vpop.xlane.xlu0 %395  ;;  %v432_v0 = vmul.f32 0.015625, %v402_v57  ;;  %v431_v6 = vmul.f32 0.015625, %v399_v56  ;;  %v494_v54 = vsel %vm482_vm1, %v493_v39, %v492_v35 }
  0xb1   : > { %v430_v7 = vmul.f32 0.015625, %v396_v59  ;;  %v483_v56 = vsel %vm482_vm1, %v481_v41, %v479_v40 }
  0xb3   : > { %v444_v16 = vpack.c.bf16 %v431_v6, %v430_v7 }
  0xb5   : > { %v467_v30 = vunpack.c.l.b16 %v444_v16  ;;  %v468_v42 = vunpack.c.h.b16 %v444_v16  ;;  %v440_v16 = vld [vmem:[#allocation2] sm:$0xf] }
  0xb7   : > { %v408_v60 = vpop.xlane.xlu1 %407  ;;  %v411_v2 = vpop.xlane.xlu2 %410  ;;  %v495_v43 = vperm.slane %v467_v30, %v484_v31  ;;  %v497_v57 = vperm.slane %v468_v42, %v488_v46 }
  0xb8   : > { %v405_v61 = vpop.xlane.xlu0 %404  ;;  %v434_v10 = vmul.f32 0.015625, %v408_v60  ;;  %v435_v11 = vmul.f32 0.015625, %v411_v2  ;;  %v487_v2 = vsel %vm486_vm2, %v485_v51, %v483_v56 }
  0xb9   : > { %v433_v1 = vmul.f32 0.015625, %v405_v61  ;;  %v496_v58 = vsel %vm486_vm2, %v495_v43, %v494_v54  ;;  %v491_v8 = vsel %vm490_vm3, %v489_v3, %v487_v2 }
  0xba   : > { %v446_v19 = vpack.c.bf16 %v435_v11, %v434_v10  ;;  %v498_v4 = vsel %vm490_vm3, %v497_v57, %v496_v58 }
  0xbb   : > { %v445_v13 = vpack.c.bf16 %v433_v1, %v432_v0  ;;  %v514_v11 = vsel %vm513_vm4, %v498_v4, %v491_v8 }
  0xbc   : > { %v471_v32 = vunpack.c.l.b16 %v446_v19  ;;  %v472_v44 = vunpack.c.h.b16 %v446_v19 }
  0xbd   : > { %v469_v23 = vunpack.c.l.b16 %v445_v13  ;;  %v470_v24 = vunpack.c.h.b16 %v445_v13 }
  0xbe   : > { %v502_v47 = vperm.slane %v471_v32, %v484_v31  ;;  %v504_v59 = vperm.slane %v472_v44, %v488_v46 }
  0xbf   : > { %v417_v17 = vpop.xlane.xlu1 %416  ;;  %v420_v34 = vpop.xlane.xlu2 %419  ;;  %v499_v37 = vperm.slane %v469_v23, %v478_v14  ;;  %v500_v38 = vperm.slane %v470_v24, %v480_v26 }
  0xc0   : > { %v437_v20 = vmul.f32 0.015625, %v417_v17  ;;  %v414_v21 = vpop.xlane.xlu0 %413  ;;  %v438_v45 = vmul.f32 0.015625, %v420_v34 }
  0xc1   : > { %v436_v25 = vmul.f32 0.015625, %v414_v21  ;;  %v501_v52 = vsel %vm482_vm1, %v500_v38, %v499_v37 }
  0xc2   : > { %v503_v63 = vsel %vm486_vm2, %v502_v47, %v501_v52 }
  0xc3   : > { %v447_v33 = vpack.c.bf16 %v437_v20, %v436_v25  ;;  %v505_v7 = vsel %vm490_vm3, %v504_v59, %v503_v63 }
  0xc4   : > { %v516_v13 = vsel %vm515_vm5, %v505_v7, %v514_v11 }
  0xc5   : > { %v473_v48 = vunpack.c.l.b16 %v447_v33  ;;  %v474_v49 = vunpack.c.h.b16 %v447_v33 }
  0xc7   : > { %v506_v61 = vperm.slane %v473_v48, %v478_v14  ;;  %v507_v62 = vperm.slane %v474_v49, %v480_v26 }
  0xc8   : > { %v423_v50 = vpop.xlane.xlu0 %422 }
  0xc9   : > { %v439_v53 = vmul.f32 0.015625, %v423_v50  ;;  %v508_v9 = vsel %vm482_vm1, %v507_v62, %v506_v61 }
  0xcb   : > { %v448_v60 = vpack.c.bf16 %v439_v53, %v438_v45 }
  0xcd   : > { %v475_v0 = vunpack.c.l.b16 %v448_v60  ;;  %v476_v1 = vunpack.c.h.b16 %v448_v60 }
  0xcf   : > { %v509_v5 = vperm.slane %v475_v0, %v484_v31  ;;  %v511_v6 = vperm.slane %v476_v1, %v488_v46 }
  0xd1   : > { %v510_v10 = vsel %vm486_vm2, %v509_v5, %v508_v9 }
  0xd2   : > { %v512_v12 = vsel %vm490_vm3, %v511_v6, %v510_v10 }
  0xd3   : > { %v518_v14 = vsel %vm517_vm6, %v512_v12, %v516_v13 }
  0xd4   : > { %v519_v15 = vpack.c.b16 %v518_v14, %v518_v14 }
  0xd6   : > { %692 = vmatmul.msk.bf16.vlgmr.msra.gmra.mxu0 %vm532_vm7, %v519_v15 }
 0x153   : > { %v545_v17 = vpop.f32.mrf.mxu0 }
 0x154   : > { %v549_v18 = vadd.f32 %v545_v17, %v440_v16 }
 0x156   : > { %550 = vst [vmem:[#allocation2] sm:$0xf] %v549_v18 }
 0x157   : > { %554 = sbr.rel (%p693_p10) target bundleno = 556 (0x22c), region = 89 }
 0x15b   : > { %v547_v19 = vpop.f32.mrf.mxu0 }
 0x15c   : > { %v764_v21 = vld [vmem:[%s939_s2] ss:$0 sm:$0xff]  ;;  %vm561_vm8 = vcmask 1043456   ;;  %v798_v23 = vmov 4.0  }
 0x15d   : > { %v555_v20 = vld [vmem:[#allocation2] sm:$0xf]  ;;  %767 = vrcp.f32 %v798_v23 }
 0x15e   : > { %v560_v22 = vadd.f32 %v764_v21, %v555_v20  ;;  %v765_v55 = vld [vmem:[%s940_s3] ss:$0 sm:$0xff] }
 0x15f   : > { %v766_v58 = vld [vmem:[%s941_s4] ss:$0 sm:$0xff] }
 0x160   : > { %v562_v24 = vsel %vm561_vm8, %v560_v22, 0.0 }
 0x161   : > { %v563_v25 = vrot.slane %v562_v24, 4 }
 0x163   : > { %v564_v26 = vadd.f32 %v563_v25, %v562_v24  ;;  %v768_v27 = vpop.eup %767 }
 0x164   : > { %v570_v29 = vmul.f32 4.0, %v768_v27  ;;  %vm574_vm9 = vweird.f32 %v768_v27 }
 0x165   : > { %v565_v28 = vrot.slane %v564_v26, 2 }
 0x166   : > { %v571_v31 = vsub.f32 1.0, %v570_v29 }
 0x167   : > { %v566_v30 = vadd.f32 %v565_v28, %v564_v26 }
 0x168   : > { %v572_v33 = vmul.f32 %v768_v27, %v571_v31 }
 0x169   : > { %v567_v32 = vrot.slane %v566_v30, 1 }
 0x16a   : > { %v573_v35 = vadd.f32 %v768_v27, %v572_v33 }
 0x16b   : > { %v568_v34 = vadd.f32 %v567_v32, %v566_v30 }
 0x16c   : > { %v575_v36 = vsel %vm574_vm9, %v768_v27, %v573_v35 }
 0x16d   : > { %v576_v37 = vmul.f32 %v575_v36, %v568_v34 }
 0x16f   : > { %v577_v38 = vsub.f32 %v560_v22, %v576_v37 }
 0x171   : > { %v578_v39 = vmul.f32 %v577_v38, %v577_v38 }
 0x173   : > { %v579_v40 = vsel %vm561_vm8, %v578_v39, 0.0 }
 0x174   : > { %v580_v41 = vrot.slane %v579_v40, 4 }
 0x176   : > { %v581_v42 = vadd.f32 %v580_v41, %v579_v40 }
 0x178   : > { %v582_v43 = vrot.slane %v581_v42, 2 }
 0x17a   : > { %v583_v44 = vadd.f32 %v582_v43, %v581_v42 }
 0x17c   : > { %v584_v45 = vrot.slane %v583_v44, 1 }
 0x17e   : > { %v585_v46 = vadd.f32 %v584_v45, %v583_v44 }
 0x180   : > { %v586_v47 = vmul.f32 %v585_v46, %v575_v36 }
 0x182   : > { %v587_v48 = vadd.f32 1e-05, %v586_v47 }
 0x184   : > { %769 = vrsqrt.f32 %v587_v48  ;;  %vm594_vm10 = vweird.f32 %v587_v48 }
 0x18a   : > { %v770_v49 = vpop.eup %769 }
 0x18b   : > { %v589_v50 = vmul.f32 %v770_v49, %v587_v48  ;;  %vm595_vm11 = vweird.f32 %v770_v49 }
 0x18c   : > { %vm596_vm12 = vmor %vm594_vm10, %vm595_vm11 }
 0x18d   : > { %v590_v51 = vmul.f32 %v770_v49, %v589_v50 }
 0x18f   : > { %v591_v52 = vmul.f32 0.5, %v590_v51 }
 0x191   : > { %v592_v53 = vsub.f32 1.5, %v591_v52 }
 0x193   : > { %v593_v54 = vmul.f32 %v770_v49, %v592_v53 }
 0x195   : > { %v597_v56 = vsel %vm596_vm12, %v770_v49, %v593_v54 }
 0x196   : > { %v598_v57 = vmul.f32 %v597_v56, %v577_v38 }
 0x198   : > { %v603_v59 = vmul.f32 %v765_v55, %v598_v57 }
 0x19a   : > { %v608_v60 = vadd.f32 %v766_v58, %v603_v59 }
 0x19c   : > { %v609_v61 = vmul.f32 %v608_v60, %v608_v60 }
 0x19e   : > { %v610_v62 = vsel %vm561_vm8, %v609_v61, 0.0 }
 0x19f   : > { %611 = vadd.xlane.f32.xlu0 %v610_v62 }
 0x212   : > { %v612_v63 = vpop.xlane.xlu0 %611 }
 0x213   : > { %v613_v0 = vmax.f32 %v612_v63, 1e-24 }
 0x215   : > { %771 = vrsqrt.f32 %v613_v0  ;;  %vm620_vm14 = vweird.f32 %v613_v0 }
 0x21b   : > { %v772_v1 = vpop.eup %771 }
 0x21c   : > { %v615_v2 = vmul.f32 %v772_v1, %v613_v0  ;;  %vm621_vm13 = vweird.f32 %v772_v1 }
 0x21d   : > { %vm622_vm15 = vmor %vm620_vm14, %vm621_vm13 }
 0x21e   : > { %v616_v3 = vmul.f32 %v772_v1, %v615_v2 }
 0x220   : > { %v617_v4 = vmul.f32 0.5, %v616_v3 }
 0x222   : > { %v618_v5 = vsub.f32 1.5, %v617_v4 }
 0x224   : > { %v619_v6 = vmul.f32 %v772_v1, %v618_v5 }
 0x226   : > { %v623_v7 = vsel %vm622_vm15, %v772_v1, %v619_v6 }
 0x227   : > { %v624_v8 = vmul.f32 %v623_v7, %v608_v60 }
 0x229   : > { %v625_v9 = vpack.c.bf16 %v624_v8, %v624_v8 }
 0x22b   : > { %626 = vst [vmem:[%s942_s5] sm:$0x3] %v625_v9 }
 0x22c PF: > { %p12_p11 = scmp.ge.s32.totalorder %s848_s22, 4   ;;  %s943_s18 = smov %s791_s19 }
 0x22d   : > { %s944_s19 = smov %s857_s25  ;;  %s945_s20 = smov %s848_s22 }
 0x22e   :  { %14 = sbr.rel (!%p12_p11) target bundleno = 2 (0x2), region = 123 }

</bundles_post_ra>
